<compile_context>
chip_gen: v5e
topology: v5e:2x2
jax: 0.10.0
libtpu: 0.0.40
codegen_flags: <defaults>
</compile_context>

<pallas_src>
import functools

import jax
import jax.numpy as jnp
from jax import lax
from jax.experimental import pallas as pl
from jax.experimental.pallas import tpu as pltpu


def _round_up(x, m):
    return ((x + m - 1) // m) * m


def _vmem_budget_bytes():
    """Per-core VMEM budget with compiler internal-scratch headroom."""
    cap = 64 * 1024 * 1024  # conservative fallback = v7x per-TC VMEM
    try:
        cap = int(pltpu.get_tpu_info().vmem_capacity_bytes)
    except Exception:
        pass
    # ~70% of physical capacity: ~45 MiB on v7x (64 MiB), ~90 MiB on v5e/v6e.
    return int(cap * 0.7)


def _footprint_bytes(tm, tk, tn, act_cols, itemsize, use_scratch):
    """Double-buffered VMEM footprint estimate for one grid step."""
    return (2 * 2 * tm * act_cols * itemsize   # hidden + attn, 2 buffers each
            + 2 * tk * tn * itemsize           # weight tile, 2 buffers
            + 2 * tn * 4                       # bias tile (f32)
            + 2 * tm * tn * itemsize           # output tile
            + (tm * tn * 4 if use_scratch else 0))   # f32 accumulator scratch


def _tile_sizes(batch, hidden_size, domain_size, itemsize, vmem_budget):
    # Sub-32-bit dtypes pack along sublanes: round the M tile accordingly.
    sub = {1: 32, 2: 16}.get(itemsize, 8)
    tm = min(_round_up(batch, sub), 256)

    hp = _round_up(hidden_size, 128)
    dp = _round_up(domain_size, 128)

    # N tile: lane-dense; keep >=2 N tiles when Dp >= 256 so the v7x megacore
    # can shard the (only) parallel axis when B is a single M tile.
    tn = min(dp, 2048)
    if dp >= 256:
        tn = min(tn, max(128, (dp // 2) // 128 * 128))

    # K tile: lane-dense; large K tiles cut per-step overhead (~0.35 us) and
    # accumulator revisits, and let the weight DMA run in longer bursts.
    tk = min(hp, 2048)

    # Shrink K/N until the double-buffered footprint fits the VMEM budget.
    while (_footprint_bytes(tm, tk, tn, tk, itemsize, True) > vmem_budget
           and (tk > 128 or tn > 128)):
        if tk >= tn and tk > 128:
            tk = max(128, (tk // 2 // 128) * 128)
        else:
            tn = max(128, (tn // 2 // 128) * 128)

    return tm, tk, tn


def decoder_domain_kernel(hidden_ref, attn_ref, w_ref, b_ref, out_ref, *acc,
                          tk, act_full_h):
    """One (tm, tn) output tile; grid axis 2 (K = hidden) is the reduction.

    If no scratch is passed (f32 output), out_ref itself is the accumulator
    (its block index is independent of k, so it stays VMEM-resident).
    """
    k = pl.program_id(2)
    acc_ref = acc[0] if acc else out_ref

    @pl.when(k == 0)
    def _():
        acc_ref[...] = jnp.zeros_like(acc_ref)

    if act_full_h:
        # Activations are VMEM-resident full-H blocks; slice out the K chunk.
        off = pl.multiple_of(k * tk, 128)
        h_blk = hidden_ref[:, pl.ds(off, tk)]
        a_blk = attn_ref[:, pl.ds(off, tk)]
    else:
        h_blk = hidden_ref[...]
        a_blk = attn_ref[...]

    # Elementwise add in f32 on the VPU (v5e has no bf16 VALU), then feed the
    # MXU in the weight's dtype (bf16 weights -> bf16 x bf16, f32 accumulate).
    summed = h_blk.astype(jnp.float32) + a_blk.astype(jnp.float32)
    lhs = summed.astype(w_ref.dtype)

    # Canonical (tm, tk) x (tk, tn) contraction; the weight was transposed to
    # (Hp, Dp) once at parameter-load time -> no per-tile transpose here.
    # DEFAULT MXU precision for f32 (see note at top of file).
    acc_ref[...] += lax.dot_general(
        lhs, w_ref[...],
        dimension_numbers=(((1,), (0,)), ((), ())),
        preferred_element_type=jnp.float32)

    @pl.when(k == pl.num_programs(2) - 1)
    def _():
        # Bias broadcast (1, tn) -> (tm, tn); lane-dense unmasked store.
        out_ref[...] = (acc_ref[...] + b_ref[...]).astype(out_ref.dtype)


def prepare_decoder_domain_params(weight, bias, *, tk, tn, param_dtype=None):
    """Pad + transpose (+ optionally cast) Linear params ONCE at load time.

    weight: (D, H) PyTorch layout; bias: (D,).
    Returns:
      w_t_pad: (Hp, Dp) = weight.T zero-padded (Hp % tk == 0, Dp % tn == 0),
               optionally cast to `param_dtype` (e.g. bf16).
      b_pad:   (1, Dp) f32 bias (added into the f32 accumulator in-kernel).
    """
    d, h = weight.shape
    hp = _round_up(h, tk)
    dp = _round_up(d, tn)
    w_t = jnp.asarray(weight).T                      # one-time transpose
    if param_dtype is not None:
        w_t = w_t.astype(param_dtype)
    w_t_pad = jnp.pad(w_t, ((0, hp - h), (0, dp - d)))
    b_pad = jnp.pad(jnp.asarray(bias, dtype=jnp.float32),
                    (0, dp - d)).reshape(1, dp)
    return w_t_pad, b_pad


@functools.partial(
    jax.jit,
    static_argnames=("domain_size", "tm", "tk", "tn", "vmem_budget"))
def decoder_domain_apply(hidden, attn_hidden, w_t_pad, b_pad, *,
                         domain_size, tm, tk, tn, vmem_budget):
    """hidden, attn_hidden: (B, H); w_t_pad: (Hp, Dp); b_pad: (1, Dp)."""
    b, h = hidden.shape
    hp, dp = w_t_pad.shape
    mp = _round_up(b, tm)
    act_itemsize = jnp.dtype(hidden.dtype).itemsize

    # Skip wrapper-side padding entirely when already tile-aligned.
    if (mp, hp) != (b, h):
        hidden_p = jnp.pad(hidden, ((0, mp - b), (0, hp - h)))
        attn_p = jnp.pad(attn_hidden, ((0, mp - b), (0, hp - h)))
    else:
        hidden_p, attn_p = hidden, attn_hidden

    grid = (mp // tm, dp // tn, hp // tk)
    grid_j = grid[1]

    # Accumulate directly into out_ref for f32 outputs (no scratch needed).
    use_scratch = jnp.dtype(hidden.dtype) != jnp.dtype(jnp.float32)

    # Keep activations VMEM-resident across the (j, k) axes when they fit.
    act_full_h = _footprint_bytes(tm, tk, tn, hp, act_itemsize,
                                  use_scratch) <= vmem_budget
    act_cols = hp if act_full_h else tk

    if act_full_h:
        act_spec = pl.BlockSpec((tm, hp), lambda i, j, k: (i, 0))
    else:
        act_spec = pl.BlockSpec((tm, tk), lambda i, j, k: (i, k))

    w_itemsize = jnp.dtype(w_t_pad.dtype).itemsize
    cost = pl.CostEstimate(
        flops=2 * mp * dp * hp + mp * hp,
        transcendentals=0,
        bytes_accessed=(act_itemsize * 2 * mp * hp * (1 if act_full_h else grid_j)
                        + w_itemsize * dp * hp
                        + act_itemsize * mp * dp
                        + 4 * dp),
    )

    fp = _footprint_bytes(tm, tk, tn, act_cols, act_itemsize, use_scratch)
    vmem_limit = int(min(vmem_budget, max(2 * fp, 4 * 1024 * 1024)))

    kernel = functools.partial(decoder_domain_kernel, tk=tk,
                               act_full_h=act_full_h)
    scratch_shapes = ([pltpu.VMEM((tm, tn), jnp.float32)]
                      if use_scratch else [])

    out_padded = pl.pallas_call(
        kernel,
        out_shape=jax.ShapeDtypeStruct((mp, dp), hidden.dtype),
        grid_spec=pltpu.PrefetchScalarGridSpec(
            num_scalar_prefetch=0,
            grid=grid,
            in_specs=[
                act_spec,                                          # hidden
                act_spec,                                          # attn_hidden
                # TODO(synk): sweep pipeline_mode=pl.Buffered(3) here if a v7x
                # profile shows exposed weight-DMA latency at tile boundaries.
                pl.BlockSpec((tk, tn), lambda i, j, k: (k, j)),    # weight (Hp,Dp)
                pl.BlockSpec((1, tn), lambda i, j, k: (0, j)),     # bias
            ],
            out_specs=pl.BlockSpec((tm, tn), lambda i, j, k: (i, j)),
            scratch_shapes=scratch_shapes,
        ),
        compiler_params=pltpu.CompilerParams(
            dimension_semantics=("parallel", "parallel", "arbitrary"),
            vmem_limit_bytes=vmem_limit,
        ),
        cost_estimate=cost,
    )(hidden_p, attn_p, w_t_pad, b_pad)

    # Slice the padding off outside the kernel (lane-dense stores inside).
    return out_padded[:b, :domain_size]


def decoder_domain(hidden, attn_hidden, weight, bias, *, param_dtype=None):
    """One-shot convenience path (pads/casts params per call).

    Production code should call prepare_decoder_domain_params ONCE at
    parameter-load time and reuse w_t_pad / b_pad across steps.
    """
    b, h = hidden.shape
    d = weight.shape[0]
    act_dtype = jnp.dtype(param_dtype) if param_dtype is not None \
        else jnp.dtype(hidden.dtype)
    itemsize = act_dtype.itemsize

    budget = _vmem_budget_bytes()
    tm, tk, tn = _tile_sizes(b, h, d, itemsize, budget)
    w_t_pad, b_pad = prepare_decoder_domain_params(
        weight, bias, tk=tk, tn=tn, param_dtype=param_dtype)
    if param_dtype is not None:
        hidden = hidden.astype(param_dtype)
        attn_hidden = attn_hidden.astype(param_dtype)
    return decoder_domain_apply(hidden, attn_hidden, w_t_pad, b_pad,
                                domain_size=d, tm=tm, tk=tk, tn=tn,
                                vmem_budget=budget)


if __name__ == "__main__":
    # Small shapes consistent with the module: batch=8, hidden=32, domain=16.
    batch, hidden_size, domain_size = 8, 32, 16

    key = jax.random.PRNGKey(0)
    k_h, k_a, k_w, k_b = jax.random.split(key, 4)

    hidden = jax.random.normal(k_h, (batch, hidden_size), dtype=jnp.float32)
    attn_hidden = jax.random.normal(k_a, (batch, hidden_size),
                                    dtype=jnp.float32)

    # Deterministic Linear params (PyTorch-style uniform(-1/sqrt(H), 1/sqrt(H))).
    bound = 1.0 / (hidden_size ** 0.5)
    weight = jax.random.uniform(k_w, (domain_size, hidden_size),
                                minval=-bound, maxval=bound, dtype=jnp.float32)
    bias = jax.random.uniform(k_b, (domain_size,),
                              minval=-bound, maxval=bound, dtype=jnp.float32)

    # --- f32 path (reference semantics) ---
    out = decoder_domain(hidden, attn_hidden, weight, bias)
    out = jax.block_until_ready(out)
    ref = (hidden + attn_hidden) @ weight.T + bias
    assert out.shape == (batch, domain_size)
    assert jnp.allclose(out, ref, atol=1e-4, rtol=1e-4), "f32 mismatch vs ref"

    # --- bf16 production path (bf16 weights/activations, f32 accumulator) ---
    out_bf16 = decoder_domain(hidden, attn_hidden, weight, bias,
                              param_dtype=jnp.bfloat16)
    out_bf16 = jax.block_until_ready(out_bf16)
    h_bf = hidden.astype(jnp.bfloat16).astype(jnp.float32)
    a_bf = attn_hidden.astype(jnp.bfloat16).astype(jnp.float32)
    w_bf = weight.astype(jnp.bfloat16).astype(jnp.float32)
    ref_bf = (h_bf + a_bf) @ w_bf.T + bias
    assert out_bf16.shape == (batch, domain_size)
    assert jnp.allclose(out_bf16.astype(jnp.float32), ref_bf,
                        atol=5e-2, rtol=5e-2), "bf16 mismatch vs ref"

    print("KERNEL_OK")
</pallas_src>

<mosaic_0001>
module attributes {stable_mosaic.version = 11 : i64} {
  func.func @decoder_domain_kernel(%arg0: i32, %arg1: i32, %arg2: i32, %arg3: memref<8x128xf32, #tpu.memory_space<vmem>>, %arg4: memref<8x128xf32, #tpu.memory_space<vmem>>, %arg5: memref<128x128xf32, #tpu.memory_space<vmem>>, %arg6: memref<1x128xf32, #tpu.memory_space<vmem>>, %arg7: memref<8x128xf32, #tpu.memory_space<vmem>>) attributes {dimension_semantics = [#tpu.dimension_semantics<parallel>, #tpu.dimension_semantics<parallel>, #tpu.dimension_semantics<arbitrary>], iteration_bounds = array<i64: 1, 1, 1>, scalar_prefetch = 0 : i64, scratch_operands = 0 : i64, tpu.core_type = #tpu.core_type<tc>, window_params = [{transform_indices = @transform_0, window_bounds = array<i64: 8, 128>}, {transform_indices = @transform_1, window_bounds = array<i64: 8, 128>}, {transform_indices = @transform_2, window_bounds = array<i64: 128, 128>}, {transform_indices = @transform_3, window_bounds = array<i64: 1, 128>}, {transform_indices = @transform_4, window_bounds = array<i64: 8, 128>}]} {
    %c0_i32 = arith.constant 0 : i32
    %0 = arith.cmpi eq, %arg2, %c0_i32 : i32
    %1 = arith.extui %0 : i1 to i32
    %c0_i32_0 = arith.constant 0 : i32
    %2 = arith.cmpi ne, %1, %c0_i32_0 : i32
    scf.if %2 {
      %cst_10 = arith.constant 0.000000e+00 : f32
      %18 = vector.broadcast %cst_10 : f32 to vector<8x128xf32>
      %c0_11 = arith.constant 0 : index
      %c0_12 = arith.constant 0 : index
      %19 = vector.load %arg7[%c0_11, %c0_12] : memref<8x128xf32, #tpu.memory_space<vmem>>, vector<8x128xf32>
      tpu.vector_store %arg7[%c0_11, %c0_12], %18 {strides = array<i32>} : memref<8x128xf32, #tpu.memory_space<vmem>>, vector<8x128xf32>,
    } else {
    }
    %c128_i32 = arith.constant 128 : i32
    %3 = arith.muli %arg2, %c128_i32 : i32
    %4 = tpu.assume_multiple %3, 128 : i32
    %c0 = arith.constant 0 : index
    %5 = arith.index_cast %4 : i32 to index
    %6 = vector.load %arg3[%c0, %5] : memref<8x128xf32, #tpu.memory_space<vmem>>, vector<8x128xf32>
    %c0_1 = arith.constant 0 : index
    %7 = arith.index_cast %4 : i32 to index
    %8 = vector.load %arg4[%c0_1, %7] : memref<8x128xf32, #tpu.memory_space<vmem>>, vector<8x128xf32>
    %9 = arith.addf %6, %8 : vector<8x128xf32>
    %c0_2 = arith.constant 0 : index
    %c0_3 = arith.constant 0 : index
    %10 = vector.load %arg7[%c0_2, %c0_3] : memref<8x128xf32, #tpu.memory_space<vmem>>, vector<8x128xf32>
    %c0_4 = arith.constant 0 : index
    %c0_5 = arith.constant 0 : index
    %11 = vector.load %arg5[%c0_4, %c0_5] : memref<128x128xf32, #tpu.memory_space<vmem>>, vector<128x128xf32>
    %cst = arith.constant dense<0.000000e+00> : vector<8x128xf32>
    %12 = tpu.matmul %9, %11, %cst {dimension_numbers = #tpu.dot_dimension_numbers<[1], [0], [0], [1], [0, 0, 1, 1], [], []>} : vector<8x128xf32>, vector<128x128xf32>, vector<8x128xf32> -> vector<8x128xf32>
    %13 = arith.addf %10, %12 : vector<8x128xf32>
    %c0_6 = arith.constant 0 : index
    %c0_7 = arith.constant 0 : index
    %14 = vector.load %arg7[%c0_6, %c0_7] : memref<8x128xf32, #tpu.memory_space<vmem>>, vector<8x128xf32>
    tpu.vector_store %arg7[%c0_6, %c0_7], %13 {strides = array<i32>} : memref<8x128xf32, #tpu.memory_space<vmem>>, vector<8x128xf32>,
    %c0_i32_8 = arith.constant 0 : i32
    %15 = arith.cmpi eq, %arg2, %c0_i32_8 : i32
    %16 = arith.extui %15 : i1 to i32
    %c0_i32_9 = arith.constant 0 : i32
    %17 = arith.cmpi ne, %16, %c0_i32_9 : i32
    scf.if %17 {
      %c0_10 = arith.constant 0 : index
      %c0_11 = arith.constant 0 : index
      %18 = vector.load %arg7[%c0_10, %c0_11] : memref<8x128xf32, #tpu.memory_space<vmem>>, vector<8x128xf32>
      %c0_12 = arith.constant 0 : index
      %c0_13 = arith.constant 0 : index
      %19 = vector.load %arg6[%c0_12, %c0_13] : memref<1x128xf32, #tpu.memory_space<vmem>>, vector<1x128xf32>
      %20 = vector.broadcast %19 : vector<1x128xf32> to vector<8x128xf32>
      %21 = arith.addf %18, %20 : vector<8x128xf32>
      %c0_14 = arith.constant 0 : index
      %c0_15 = arith.constant 0 : index
      %22 = vector.load %arg7[%c0_14, %c0_15] : memref<8x128xf32, #tpu.memory_space<vmem>>, vector<8x128xf32>
      tpu.vector_store %arg7[%c0_14, %c0_15], %21 {strides = array<i32>} : memref<8x128xf32, #tpu.memory_space<vmem>>, vector<8x128xf32>,
    } else {
    }
    return
  }
  func.func @transform_0(%arg0: i32, %arg1: i32, %arg2: i32) -> (i32, i32) {
    %c0_i32 = arith.constant 0 : i32
    %c0_i32_0 = arith.constant 0 : i32
    return %arg0, %c0_i32 : i32, i32
  }
  func.func @transform_1(%arg0: i32, %arg1: i32, %arg2: i32) -> (i32, i32) {
    %c0_i32 = arith.constant 0 : i32
    %c0_i32_0 = arith.constant 0 : i32
    return %arg0, %c0_i32 : i32, i32
  }
  func.func @transform_2(%arg0: i32, %arg1: i32, %arg2: i32) -> (i32, i32) {
    %c0_i32 = arith.constant 0 : i32
    return %arg2, %arg1 : i32, i32
  }
  func.func @transform_3(%arg0: i32, %arg1: i32, %arg2: i32) -> (i32, i32) {
    %c0_i32 = arith.constant 0 : i32
    %c0_i32_0 = arith.constant 0 : i32
    return %c0_i32, %arg1 : i32, i32
  }
  func.func @transform_4(%arg0: i32, %arg1: i32, %arg2: i32) -> (i32, i32) {
    %c0_i32 = arith.constant 0 : i32
    return %arg0, %arg1 : i32, i32
  }
}

</mosaic_0001>

<bundles_post_ra>
// kernel: decoder_domain_apply.1
= control target key start
LH: loop header
LB: loop body
LE: loop exit
PB: predicated region body
PF: predicated region fallthrough
CT: control target
= control target key end

     0   :  { %9 = vsyncpa [#allocation3], 0  ;;  %s217_s0 = inlined_call_operand.vmem [shape: f32[8,128], index: 0, kind: input, shape index: {}]   ;;  %s218_s1 = inlined_call_operand.vmem [shape: f32[8,128], index: 1, kind: input, shape index: {}]   ;;  %s219_s2 = inlined_call_operand.hbm [shape: f32[128,128], index: 2, kind: input, shape index: {}]   ;;  %s220_s3 = inlined_call_operand.vmem [shape: f32[1,128], index: 3, kind: input, shape index: {}]   ;;  %s221_s4 = inlined_call_operand.hbm [shape: f32[8,128], index: 4, kind: output, shape index: {}]  }
   0x1   :  { %10 = vsyncpa [#allocation4], 0  ;;  %s19_s17 = sshll.u32 %s219_s2, 4  ;;  %s173_s18 = smov [#allocation2]   ;;  %s20_s17 = int_to_ptr.hbm [resolvable:$true] %s19_s17 }
   0x2   :  { %s21_s19 = sshll.u32 %s173_s18, 4  ;;  %s174_s20 = smov 128   ;;  %s22_s19 = int_to_ptr.vmem [resolvable:$true] %s21_s19 }
   0x3   :  { %s175_s21 = smov 8  }
   0x4   :  { %27 = dma.hbm_to_vmem [thread:$0]  %s20_s17, 2048, %s22_s19, [#allocation3], %s174_s20, %s174_s20, %s175_s21  }
   0x5   :  { %169 = dma.done.wait [#allocation3], 2048  }
   0x6   :  { %170 = vsyncadd [#allocation3], 4294965248  ;;  %v63_v0 = vld [vmem:[#allocation2 + $0x78] sm:$0xff]  ;;  %v62_v1 = vld [vmem:[#allocation2 + $0x70] sm:$0xff]  ;;  %s176_s27 = smov [#allocation5]   ;;  %s103_s30 = sshll.u32 %s221_s4, 4  ;;  %s104_s30 = int_to_ptr.hbm [resolvable:$true] %s103_s30 }
   0x7   :  { %64 = vmatpush.msra.mxu0 %v63_v0  ;;  %v61_v2 = vld [vmem:[#allocation2 + $0x68] sm:$0xff]  ;;  %v60_v3 = vld [vmem:[#allocation2 + $0x60] sm:$0xff]  ;;  %v59_v4 = vld [vmem:[#allocation2 + $0x58] sm:$0xff]  ;;  %s101_s28 = sshll.u32 %s176_s27, 4  ;;  %s102_s28 = int_to_ptr.vmem [resolvable:$true] %s101_s28 }
   0x8   :  { %v58_v5 = vld [vmem:[#allocation2 + $0x50] sm:$0xff]  ;;  %v57_v6 = vld [vmem:[#allocation2 + $0x48] sm:$0xff]  ;;  %v56_v7 = vld [vmem:[#allocation2 + $0x40] sm:$0xff] }
   0x9   :  { %65 = vmatpush.msra.mxu0 %v62_v1  ;;  %v55_v8 = vld [vmem:[#allocation2 + $0x38] sm:$0xff]  ;;  %v54_v9 = vld [vmem:[#allocation2 + $0x30] sm:$0xff]  ;;  %v53_v10 = vld [vmem:[#allocation2 + $0x28] sm:$0xff] }
   0xa   :  { %v52_v11 = vld [vmem:[#allocation2 + $0x20] sm:$0xff]  ;;  %v51_v12 = vld [vmem:[#allocation2 + $0x18] sm:$0xff]  ;;  %v50_v13 = vld [vmem:[#allocation2 + $0x10] sm:$0xff] }
   0xb   :  { %66 = vmatpush.msra.mxu0 %v61_v2  ;;  %v43_v14 = vld [vmem:[%s217_s0] sm:$0xff]  ;;  %v49_v16 = vld [vmem:[#allocation2 + $0x8] sm:$0xff] }
   0xc   :  { %v45_v15 = vld [vmem:[%s218_s1] sm:$0xff] }
   0xd   :  { %67 = vmatpush.msra.mxu0 %v60_v3  ;;  %v48_v17 = vld [vmem:[#allocation2] sm:$0xff]  ;;  %v46_v18 = vadd.f32 %v45_v15, %v43_v14 }
   0xe   :  { %v120_v19 = vld [vmem:[%s220_s3] ss:$0 sm:$0xff] }
   0xf   :  { %68 = vmatpush.msra.mxu0 %v59_v4 }
  0x11   :  { %69 = vmatpush.msra.mxu0 %v58_v5 }
  0x13   :  { %70 = vmatpush.msra.mxu0 %v57_v6 }
  0x15   :  { %71 = vmatpush.msra.mxu0 %v56_v7 }
  0x17   :  { %72 = vmatpush.msra.mxu0 %v55_v8 }
  0x19   :  { %73 = vmatpush.msra.mxu0 %v54_v9 }
  0x1b   :  { %74 = vmatpush.msra.mxu0 %v53_v10 }
  0x1d   :  { %75 = vmatpush.msra.mxu0 %v52_v11 }
  0x1f   :  { %76 = vmatpush.msra.mxu0 %v51_v12 }
  0x21   :  { %77 = vmatpush.msra.mxu0 %v50_v13 }
  0x23   :  { %78 = vmatpush.msra.mxu0 %v49_v16 }
  0x25   :  { %79 = vmatpush.msra.mxu0 %v48_v17 }
  0x26   :  { %80 = vmatmul.f32.vlgmr.msra.gmra.mxu0 %v46_v18 }
  0xa3   :  { %v81_v20 = vpop.f32.mrf.mxu0 }
  0xa4   :  { %v94_v21 = vadd.f32 %v120_v19, %v81_v20 }
  0xa6   :  { %95 = vst [vmem:[#allocation5] sm:$0xff] %v94_v21 }
  0xa7   :  { %106 = dma.vmem_to_hbm [thread:$0]  %s102_s28, 128, %s104_s30, [#allocation4]  }
  0xa8   :  { %171 = dma.done.wait [#allocation4], 128  }
  0xa9   :  { %172 = vsyncadd [#allocation4], 4294967168 }
  0xaa   :  { %111 = vsyncpa [#allocation3], 1 }
  0xab   :  { %112 = vsyncpa [#allocation4], 1 }

</bundles_post_ra>
